<compile_context>
chip_gen: v6e
topology: v6e:2x2x1
jax: 0.10.0
libtpu: 0.0.40
codegen_flags: <defaults>
</compile_context>

<pallas_src>
import jax
import jax.numpy as jnp
from jax.experimental import pallas as pl
from jax.experimental.pallas import tpu as pltpu


def _flat_conv1x1_kernel(w_ref, x_ref, o_ref):
    # w_ref: (C_out, C_in) resident; x_ref: (C_in, TL); o_ref: (C_out, TL)
    o_ref[...] = jnp.dot(
        w_ref[...], x_ref[...], preferred_element_type=jnp.float32
    ).astype(o_ref.dtype)


def _flat_conv1x1_acc_kernel(w_ref, x_ref, o_ref, acc_ref):
    # K-tiled variant: w_ref (C_out, TK); x_ref (TK, TL); acc_ref f32 (C_out, TL)
    k = pl.program_id(2)

    @pl.when(k == 0)
    def _():
        acc_ref[...] = jnp.zeros_like(acc_ref)

    acc_ref[...] += jnp.dot(
        w_ref[...], x_ref[...], preferred_element_type=jnp.float32
    )

    @pl.when(k == pl.num_programs(2) - 1)
    def _():
        o_ref[...] = acc_ref[...].astype(o_ref.dtype)


def _round_up(n, m):
    return ((n + m - 1) // m) * m


def _pick_tile_k(c_in):
    """Reduction (C_in) tile: no tiling unless C_in is large and divisible."""
    if c_in <= 1024 or c_in % 8 != 0:
        return c_in
    for tk in range(512, 7, -8):
        if c_in % tk == 0:
            return tk
    return c_in


def _choose_tiles(batch, c_in, c_out, length, dtype_bytes):
    """Pick (TL, TK) sized for this TPU generation's VMEM + per-step overhead."""
    try:
        vmem_bytes = pltpu.get_tpu_info().vmem_capacity_bytes
    except Exception:  # interpret mode / CPU AOT compile
        vmem_bytes = 64 * 1024 * 1024  # conservative: v7x per-TC physical VMEM

    tk = _pick_tile_k(c_in)

    # VMEM bytes consumed per lane of TL: double-buffered x + out tiles, plus
    # the f32 accumulator when the reduction axis is tiled.
    per_lane = 2 * (tk + c_out) * dtype_bytes
    if tk != c_in:
        per_lane += c_out * 4

    # Budget: quarter of physical VMEM minus the two resident weight buffers.
    budget = vmem_bytes // 4 - 2 * c_out * tk * dtype_bytes
    budget = max(budget, per_lane * 128)
    tl_vmem = budget // per_lane

    # Amortize ~0.35us/step pipeline overhead: target >= ~2 MiB HBM per step.
    tl_hbm = (2 * 1024 * 1024) // max(1, (tk + c_out) * dtype_bytes)

    tl = max(128, min(tl_vmem, max(128, tl_hbm)))
    tl = (tl // 128) * 128

    if length <= 128:
        tl = length  # single (possibly ragged) tile == full array extent
    else:
        tl = min(tl, (length // 128) * 128)  # never exceed the array extent
        # Keep enough parallel grid steps for megacore (2 TCs on v7x).
        want_steps = 4
        if batch < want_steps:
            want_l_tiles = min(pl.cdiv(want_steps, batch), length // 128)
            if want_l_tiles > 1:
                tl = min(tl, _round_up(pl.cdiv(length, want_l_tiles), 128))
    return tl, tk, vmem_bytes


def flattened_1d_conv(x, weight, *, activation_dtype=None):
    """x: (B, C_in, *spatial); weight: (C_out, C_in, 1) (Conv1d, bias=False).

    activation_dtype: optional narrower dtype (e.g. jnp.bfloat16) for x / w /
    out to halve HBM traffic; the matmul still accumulates in f32.
    """
    size = list(x.shape)
    B, C_in = size[0], size[1]
    C_out = weight.shape[0]
    assert weight.shape[1] == C_in
    assert weight.shape[2] == 1, "only kernel_size=1 preserves the spatial dims"
    L = 1
    for s in size[2:]:
        L *= s

    w2d = weight.reshape(C_out, C_in)     # drop the trivial kernel tap
    x_flat = x.reshape(B, C_in, L)        # NCL, no padding
    if activation_dtype is not None:
        x_flat = x_flat.astype(activation_dtype)
        w2d = w2d.astype(activation_dtype)
    out_dtype = x_flat.dtype
    dtype_bytes = jnp.dtype(out_dtype).itemsize

    TL, TK, vmem_bytes = _choose_tiles(B, C_in, C_out, L, dtype_bytes)
    l_tiles = pl.cdiv(L, TL)
    k_tiles = C_in // TK

    # Scoped-VMEM limit: leave 2x headroom over the tiles we actually use, but
    # never exceed half of physical VMEM (64 MiB on v5e/v6e, 32 MiB on v7x).
    needed = (2 * (TK + C_out) * TL + 2 * C_out * TK) * dtype_bytes
    if k_tiles > 1:
        needed += C_out * TL * 4
    vmem_limit = int(min(vmem_bytes // 2, max(2 * needed, 32 * 1024 * 1024)))

    cost = pl.CostEstimate(
        flops=2 * B * C_out * C_in * L,
        transcendentals=0,
        bytes_accessed=dtype_bytes * (B * C_in * L + B * C_out * L + C_out * C_in),
    )

    if k_tiles == 1:
        kernel = _flat_conv1x1_kernel
        grid = (B, l_tiles)
        in_specs = [
            pl.BlockSpec((C_out, C_in), lambda b, l: (0, 0)),        # weight
            pl.BlockSpec((None, C_in, TL), lambda b, l: (b, 0, l)),  # x tile
        ]
        out_specs = pl.BlockSpec((None, C_out, TL), lambda b, l: (b, 0, l))
        scratch_shapes = []
        dim_sem = ("parallel", "parallel")
    else:
        kernel = _flat_conv1x1_acc_kernel
        grid = (B, l_tiles, k_tiles)
        in_specs = [
            pl.BlockSpec((C_out, TK), lambda b, l, k: (0, k)),
            pl.BlockSpec((None, TK, TL), lambda b, l, k: (b, k, l)),
        ]
        out_specs = pl.BlockSpec((None, C_out, TL), lambda b, l, k: (b, 0, l))
        scratch_shapes = [pltpu.VMEM((C_out, TL), jnp.float32)]
        dim_sem = ("parallel", "parallel", "arbitrary")

    out_flat = pl.pallas_call(
        kernel,
        out_shape=jax.ShapeDtypeStruct((B, C_out, L), out_dtype),
        grid_spec=pltpu.PrefetchScalarGridSpec(
            num_scalar_prefetch=0,
            grid=grid,
            in_specs=in_specs,
            out_specs=out_specs,
            scratch_shapes=scratch_shapes,
        ),
        compiler_params=pltpu.CompilerParams(
            dimension_semantics=dim_sem,
            vmem_limit_bytes=vmem_limit,
        ),
        cost_estimate=cost,
    )(w2d, x_flat)

    return out_flat.reshape(size[0], C_out, *size[2:])


if __name__ == "__main__":
    B, C_in, C_out, H, W = 2, 4, 8, 16, 16
    key = jax.random.PRNGKey(0)
    kx, kw = jax.random.split(key)
    x = jax.random.normal(kx, (B, C_in, H, W), dtype=jnp.float32)
    # Conv1d weight shape: (out_channels, in_channels, kernel_size=1)
    weight = jax.random.normal(kw, (C_out, C_in, 1), dtype=jnp.float32) * 0.1

    # f32 path, lane-aligned spatial size (16*16 = 256).
    out = jax.block_until_ready(flattened_1d_conv(x, weight))
    ref = jnp.einsum("oc,bchw->bohw", weight[:, :, 0], x)
    assert out.shape == (B, C_out, H, W)
    assert jnp.allclose(out, ref, atol=1e-5, rtol=1e-5)

    # Ragged spatial size (14*14 = 196): last L tile masked, no wrapper pad/slice.
    x2 = jax.random.normal(kx, (B, C_in, 14, 14), dtype=jnp.float32)
    out2 = jax.block_until_ready(flattened_1d_conv(x2, weight))
    ref2 = jnp.einsum("oc,bchw->bohw", weight[:, :, 0], x2)
    assert out2.shape == (B, C_out, 14, 14)
    assert jnp.allclose(out2, ref2, atol=1e-5, rtol=1e-5)

    # Small spatial size (8*8 = 64 < 128 lanes): single full-extent tile.
    x3 = jax.random.normal(kx, (B, C_in, 8, 8), dtype=jnp.float32)
    out3 = jax.block_until_ready(flattened_1d_conv(x3, weight))
    ref3 = jnp.einsum("oc,bchw->bohw", weight[:, :, 0], x3)
    assert out3.shape == (B, C_out, 8, 8)
    assert jnp.allclose(out3, ref3, atol=1e-5, rtol=1e-5)

    # Opt-in bf16 activation path (halves HBM traffic; f32 accumulation).
    out_bf16 = jax.block_until_ready(
        flattened_1d_conv(x, weight, activation_dtype=jnp.bfloat16))
    assert out_bf16.dtype == jnp.bfloat16
    assert jnp.allclose(out_bf16.astype(jnp.float32), ref, atol=5e-2, rtol=5e-2)

    print("KERNEL_OK")
</pallas_src>

<mosaic_0001>
module attributes {stable_mosaic.version = 11 : i64} {
  func.func @_flat_conv1x1_kernel(%arg0: i32, %arg1: i32, %arg2: memref<8x4xf32, #tpu.memory_space<vmem>>, %arg3: memref<1x4x128xf32, #tpu.memory_space<vmem>>, %arg4: memref<1x8x128xf32, #tpu.memory_space<vmem>>) attributes {dimension_semantics = [#tpu.dimension_semantics<parallel>, #tpu.dimension_semantics<parallel>], iteration_bounds = array<i64: 2, 2>, scalar_prefetch = 0 : i64, scratch_operands = 0 : i64, tpu.core_type = #tpu.core_type<tc>, window_params = [{pipeline_mode = #tpu.pipeline_mode<synchronous>, transform_indices = @transform_0, window_bounds = array<i64: 8, 4>}, {transform_indices = @transform_1, window_bounds = array<i64: 1, 4, 128>}, {transform_indices = @transform_2, window_bounds = array<i64: 1, 8, 128>}]} {
    %c0 = arith.constant 0 : index
    %c0_0 = arith.constant 0 : index
    %0 = vector.load %arg2[%c0, %c0_0] : memref<8x4xf32, #tpu.memory_space<vmem>>, vector<8x4xf32>
    %c0_1 = arith.constant 0 : index
    %c0_2 = arith.constant 0 : index
    %c0_3 = arith.constant 0 : index
    %1 = vector.load %arg3[%c0_1, %c0_2, %c0_3] : memref<1x4x128xf32, #tpu.memory_space<vmem>>, vector<1x4x128xf32>
    %2 = vector.shape_cast %1 : vector<1x4x128xf32> to vector<4x128xf32>
    %cst = arith.constant dense<0.000000e+00> : vector<8x128xf32>
    %3 = tpu.matmul %0, %2, %cst {dimension_numbers = #tpu.dot_dimension_numbers<[1], [0], [0], [1], [0, 0, 1, 1], [], []>} : vector<8x4xf32>, vector<4x128xf32>, vector<8x128xf32> -> vector<8x128xf32>
    %c0_4 = arith.constant 0 : index
    %c0_5 = arith.constant 0 : index
    %c0_6 = arith.constant 0 : index
    %4 = vector.load %arg4[%c0_4, %c0_5, %c0_6] : memref<1x8x128xf32, #tpu.memory_space<vmem>>, vector<1x8x128xf32>
    %5 = vector.shape_cast %4 : vector<1x8x128xf32> to vector<8x128xf32>
    %6 = vector.shape_cast %3 : vector<8x128xf32> to vector<1x8x128xf32>
    tpu.vector_store %arg4[%c0_4, %c0_5, %c0_6], %6 {strides = array<i32>} : memref<1x8x128xf32, #tpu.memory_space<vmem>>, vector<1x8x128xf32>,
    return
  }
  func.func @transform_0(%arg0: i32, %arg1: i32) -> (i32, i32) {
    %c0_i32 = arith.constant 0 : i32
    %c0_i32_0 = arith.constant 0 : i32
    %c0_i32_1 = arith.constant 0 : i32
    return %c0_i32, %c0_i32_0 : i32, i32
  }
  func.func @transform_1(%arg0: i32, %arg1: i32) -> (i32, i32, i32) {
    %c0_i32 = arith.constant 0 : i32
    %c0_i32_0 = arith.constant 0 : i32
    return %arg0, %c0_i32, %arg1 : i32, i32, i32
  }
  func.func @transform_2(%arg0: i32, %arg1: i32) -> (i32, i32, i32) {
    %c0_i32 = arith.constant 0 : i32
    %c0_i32_0 = arith.constant 0 : i32
    return %arg0, %c0_i32, %arg1 : i32, i32, i32
  }
}

</mosaic_0001>

<bundles_post_ra>
// kernel: tpu_custom_call.1
= control target key start
LH: loop header
LB: loop body
LE: loop exit
PB: predicated region body
PF: predicated region fallthrough
CT: control target
= control target key end

     0   :  { %7 = vsyncpa [#allocation3], 0  ;;  %s780_s0 = inlined_call_operand.vmem [shape: f32[8,4], index: 0, kind: input, shape index: {}]   ;;  %s781_s1 = inlined_call_operand.hbm [shape: f32[2,4,256], index: 1, kind: input, shape index: {}]   ;;  %s782_s2 = inlined_call_operand.hbm [shape: f32[2,8,256], index: 2, kind: output, shape index: {}]  }
   0x1   :  { %9 = vsyncpa [#allocation3 + $0x1], 0 }
   0x2   :  { %10 = vsyncpa [#allocation4], 0 }
   0x3   :  { %12 = vsyncpa [#allocation4 + $0x1], 0  ;;  %s608_s9 = smov 0   ;;  %s610_s10 = smov 0  }
   0x4   :  { %s612_s11 = smov 0   ;;  %s614_s12 = smov 0  }
   0x5   :  { %s616_s13 = smov 0   ;;  %s618_s14 = smov 0  }
   0x6   :  { %s620_s15 = smov 0   ;;  %s622_s16 = smov 0  }
   0x7 LB: > { %s359_s17 = sadd.s32 4294967295, %s587_s16   ;;  %s360_s18 = sadd.s32 4294967294, %s587_s16   ;;  %s587_s16 = sphi %s622_s16, %s18_s16   ;;  %s583_s15 = sphi %s620_s15, %s795_s15   ;;  %s579_s14 = sphi %s618_s14, %s794_s14   ;;  %s575_s13 = sphi %s616_s13, %s793_s13   ;;  %s571_s12 = sphi %s614_s12, %s792_s12   ;;  %s567_s11 = sphi %s612_s11, %s791_s11   ;;  %s563_s10 = sphi %s610_s10, %s790_s10   ;;  %s559_s9 = sphi %s608_s9, %s789_s9  }
   0x8   : > { %s27_s19 = sadd.s32 1, %s579_s14  ;;  %s30_s20 = sadd.s32 1, %s583_s15 }
   0x9   : > { %p28_p0 = scmp.ge.s32.totalorder %s27_s19, 2  ;;  %s60_s21 = sadd.s32 1, %s567_s11 }
   0xa   : > { %p67_p1 = scmp.ne.s32.totalorder %s567_s11, %s563_s10  ;;  %p68_p2 = scmp.eq.s32.totalorder %s587_s16, 0 }
   0xb   : > { %s797_s19 = smov (%p28_p0, %s27_s19), 0  ;;  %s799_s20 = smov (!%p28_p0, %s30_s20), %s583_s15 }
   0xc   : > { %s56_s22 = ssub.s32 %s579_s14, %s797_s19  ;;  %p661_p3 = por %p68_p2, %p67_p1 }
   0xd   : > { %p32_p4 = scmp.ge.s32.totalorder %s799_s20, 2  ;;  %p73_p5 = scmp.ne.s32.totalorder %s563_s10, %s559_s9 }
   0xe   : > { %p74_p6 = scmp.eq.s32.totalorder %s359_s17, 0  ;;  %p99_p7 = scmp.eq.s32.totalorder %s359_s17, 3 }
   0xf   : > { %s801_s20 = smov (%p32_p4, %s799_s20), 0  ;;  %p105_p10 = scmp.eq.s32.totalorder %s360_s18, 3 }
  0x10   : > { %p669_p8 = por %p74_p6, %p73_p5  ;;  %p673_p9 = por %p99_p7, %p67_p1 }
  0x11   : > { %s55_s26 = ssub.s32 %s583_s15, %s801_s20  ;;  %p679_p12 = por %p105_p10, %p73_p5 }
  0x12   : > { %s57_s27 = sor.u32 %s56_s22, %s55_s26  ;;  %p395_p13 = scmp.lt.s32.totalorder %s587_s16, 4 }
  0x13   : > { %p58_p11 = scmp.eq.s32.totalorder %s57_s27, 0  ;;  %s128_s29 = sand.u32 1, %s567_s11  }
  0x14   : > { %s786_s28 = scalar_select %p679_p12, 1, 0 }
  0x15   : > { %s686_s30 = scalar_select %p58_p11, %s567_s11, %s60_s21  }
  0x16   : > { %s363_s3 = sshll.u32 %s128_s29, 2  ;;  %s364_s4 = sshll.u32 %s583_s15, 1 }
  0x17   : > { %s137_s5 = sadd.s32 %s579_s14, %s364_s4  ;;  %s132_s6 = scalar_lea.vmem [#allocation2], %s363_s3 }
  0x18   : > { %s141_s7 = sshll.u32 %s132_s6, 4  ;;  %s365_s8 = sshll.u32 %s137_s5, 6  ;;  %s142_s7 = int_to_ptr.vmem [resolvable:$true] %s141_s7 }
  0x19   : > { %s139_s22 = scalar_lea.hbm %s781_s1, %s365_s8  ;;  %p695_p0 = pnand %p395_p13, %p661_p3 }
  0x1a   : > { %p366_p1 = scmp.ge.s32.totalorder %s587_s16, 1  ;;  %p146_p2 = scmp.lt.s32.totalorder %s587_s16, 5 }
  0x1b   : > { %s129_s21 = scalar_lea.sflag [#allocation3], %s128_s29  ;;  %p465_p4 = pneg %p695_p0 }
  0x1c   : > { %s476_s27 = scalar_lea.vmem %s142_s7, 64  ;;  %s589_s3 = smov [#allocation2]  }
  0x1d   : > { %p477_p5 = scmp.ne.s32.totalorder %s142_s7, %s476_s27  ;;  %s481_s4 = sshll.u32 %s589_s3, 4  ;;  %s482_s4 = int_to_ptr.vmem [resolvable:$false] %s481_s4 }
  0x1e   : > { %s483_s5 = scalar_lea.vmem %s482_s4, 128  ;;  %p484_p10 = scmp.lt.s32.totalorder %s142_s7, %s482_s4 }
  0x1f   : > { %p479_p6 = pnand %p477_p5, %p465_p4  ;;  %p485_p11 = scmp.lt.s32.totalorder %s483_s5, %s476_s27 }
  0x21   : > { %p480_p7 = pneg %p479_p6  ;;  %p486_p3 = por %p485_p11, %p484_p10 }
  0x23   : > { %p487_p13 = pnand %p486_p3, %p480_p7 }
  0x25   : > { %490 = shalt.err (!%p487_p13)
}
  0x26   : > { %390 = dma.hbm_to_vmem [thread:$0]  (!%p695_p0), %s139_s22, 64, %s142_s7, %s129_s21  }
  0x27   : > { %p147_p12 = pnand %p366_p1, %p146_p2 }
  0x28   : > { %s710_s23 = sand.u32 (!%p147_p12), 1, %s563_s10  }
  0x29   : > { %150 = sbr.rel (%p147_p12) target bundleno = 257 (0x101), region = 28  ;;  %s367_s29 = sshll.u32 (!%p147_p12), %s710_s23, 2 }
  0x2a   : > { %s153_s6 = scalar_lea.sflag (!%p147_p12), [#allocation3], %s710_s23  ;;  %s156_s8 = scalar_lea.vmem (!%p147_p12), [#allocation2], %s367_s29 }
  0x2e   : > { %550 = dma.done.wait (%p669_p8), %s153_s6, 64  }
  0x2f   : > { %552 = vsyncadd (%p669_p8), %s153_s6, 4294967232  ;;  %v590_v0 = vmov 0.0   ;;  %vm591_vm0 = vmmov 0   ;;  %vm183_vm1 = vcmask 1043456   ;;  %vm179_vm2 = vcmask 31744   ;;  %v177_v2 = vld [vmem:[%s780_s0] sm:$0xff] }
  0x30   : > { %378 = vmatprep.subr.mxu0 %v590_v0  ;;  %380 = vmatprep.mubr.msk.f32.mxu0 %vm591_vm0, %v590_v0  ;;  %v178_v1 = vld [vmem:[%s156_s8] sm:$0xf]  ;;  %s368_s24 = sshll.u32 %s710_s23, 3  ;;  %s372_s18 = sshll.u32 %s575_s13, 1 }
  0x31   : > { %379 = vmatpush3.msk.msra.mxu0 %vm183_vm1, %v178_v1  ;;  %s270_s22 = sadd.s32 %s571_s12, %s372_s18  ;;  %s176_s26 = scalar_lea.vmem [#allocation5], %s368_s24 }
  0x32   : > { %381 = vmatmul.mubr.msk.f32.vlgmr.msra.gmra.mxu0 %vm179_vm2, %v177_v2  ;;  %s274_s21 = sshll.u32 %s176_s26, 4  ;;  %s373_s27 = sshll.u32 %s270_s22, 7  ;;  %s724_s21 = int_to_ptr.vmem [resolvable:$true] %s274_s21 }
  0x33   : > { %s729_s5 = scalar_lea.hbm %s782_s2, %s373_s27  ;;  %s259_s29 = scalar_lea.sflag [#allocation4], %s710_s23 }
  0x34   : > { %s491_s6 = scalar_lea.vmem %s724_s21, 128  ;;  %s592_s12 = smov [#allocation5]  }
  0x35   : > { %p492_p8 = scmp.ne.s32.totalorder %s724_s21, %s491_s6  ;;  %s495_s13 = sshll.u32 %s592_s12, 4  ;;  %s496_s13 = int_to_ptr.vmem [resolvable:$false] %s495_s13 }
  0x36   : > { %s497_s8 = scalar_lea.vmem %s496_s13, 256  ;;  %p498_p1 = scmp.lt.s32.totalorder %s724_s21, %s496_s13 }
  0x37   : > { %p493_p12 = pnand %p492_p8, %p673_p9  ;;  %p499_p2 = scmp.lt.s32.totalorder %s497_s8, %s491_s6 }
  0x39   : > { %p494_p0 = pneg %p493_p12  ;;  %p500_p4 = por %p499_p2, %p498_p1 }
  0x3b   : > { %p501_p5 = pnand %p500_p4, %p494_p0 }
  0xf2   : > { %v253_v3 = vpop.f32.mrf.mxu0 }
  0xf3   : > { %257 = vst [vmem:[%s176_s26] sm:$0xff] %v253_v3 }
  0xf4   : > { %v382_v4 = vpop.f32.mrf.mxu0 }
  0xf5   : > { %504 = shalt.err (!%p501_p5)
}
  0xf6   : > { %s505_s7 = scalar_lea.hbm %s729_s5, 128  ;;  %s509_s24 = scalar_lea.hbm %s782_s2, 512 }
  0xf7   : > { %p506_p6 = scmp.ne.s32.totalorder %s729_s5, %s505_s7  ;;  %p510_p11 = scmp.lt.s32.totalorder %s729_s5, %s782_s2 }
  0xf8   : > { %p511_p3 = scmp.lt.s32.totalorder %s509_s24, %s505_s7 }
  0xf9   : > { %p507_p7 = pnand %p506_p6, %p673_p9 }
  0xfa   : > { %p512_p13 = por %p511_p3, %p510_p11 }
  0xfb   : > { %p508_p10 = pneg %p507_p7 }
  0xfd   : > { %p513_p8 = pnand %p512_p13, %p508_p10 }
  0xff   : > { %516 = shalt.err (!%p513_p8)
}
 0x100   : > { %385 = dma.vmem_to_hbm [thread:$0]  (%p673_p9), %s724_s21, 128, %s729_s5, %s259_s29  }
 0x101 PF: > { %p396_p12 = scmp.ge.s32.totalorder %s587_s16, 2  ;;  %s286_s26 = sand.u32 1, %s559_s9  }
 0x102   : > { %p788_p0 = scmp.ne.s32.totalorder %s786_s28, 0  ;;  %s287_s27 = scalar_lea.sflag [#allocation4], %s286_s26 }
 0x104   : > { %p392_p1 = pnand %p396_p12, %p788_p0 }
 0x106   : > { %p393_p2 = pneg %p392_p1 }
 0x108   : > { %554 = dma.done.wait (%p393_p2), %s287_s27, 128  }
 0x109   : > { %556 = vsyncadd (%p393_p2), %s287_s27, 4294967168  ;;  %s18_s16 = sadd.s32 1, %s587_s16   ;;  %s789_s9 = smov %s563_s10 }
 0x10a   : > { %p15_p4 = scmp.ge.s32.totalorder %s18_s16, 6   ;;  %s790_s10 = smov %s567_s11 }
 0x10b   : > { %s791_s11 = smov %s686_s30  ;;  %s792_s12 = smov %s579_s14 }
 0x10c   : > { %s793_s13 = smov %s583_s15  ;;  %s794_s14 = smov %s797_s19 }
 0x10d   : > { %s795_s15 = smov %s801_s20  ;;  %17 = sbr.rel (!%p15_p4) target bundleno = 7 (0x7), region = 73 }
 0x112   :  { %292 = vsyncpa [#allocation3], 1 }
 0x113   :  { %294 = vsyncpa [#allocation3 + $0x1], 1 }
 0x114   :  { %295 = vsyncpa [#allocation4], 1 }
 0x115   :  { %297 = vsyncpa [#allocation4 + $0x1], 1 }

</bundles_post_ra>
